<compile_context>
chip_gen: v7x
topology: tpu7x:2x2x1
jax: 0.10.0
libtpu: 0.0.40
codegen_flags: <defaults>
</compile_context>

<pallas_src>
import math

import jax
import jax.numpy as jnp
from jax.experimental import pallas as pl
from jax.experimental.pallas import tpu as pltpu


def _round_up(x, m):
    return ((x + m - 1) // m) * m


def _gelu_f32(x):
    """Exact (erf-form) GELU in f32 via A&S 7.1.26 erf (|err| < 1.5e-7).

    The rational term's divide runs on the EUP via pl.reciprocal(approx=True),
    freeing VALU bundle slots; its error is far below the test tolerances.
    """
    z = x * 0.7071067811865476
    az = jnp.abs(z)
    sgn = jnp.where(z >= 0.0, 1.0, -1.0).astype(jnp.float32)
    t = pl.reciprocal(1.0 + 0.3275911 * az, approx=True)
    poly = ((((1.061405429 * t - 1.453152027) * t + 1.421413741) * t
             - 0.284496736) * t + 0.254829592) * t
    erf = sgn * (1.0 - poly * jnp.exp(-az * az))
    return 0.5 * x * (1.0 + erf)


def _make_trunk_kernel(n_trunk, tb, tp, latent, compute_dtype):
    def kernel(*refs):
        # refs: trunk_tile, h_tile, (WT_i, bcol_i)*n_trunk, bias_smem, out
        idx = 0
        trunk_ref = refs[idx]; idx += 1          # (TB, Dt, TP)
        h_ref = refs[idx]; idx += 1              # (TB, L)
        tparams = []
        for _ in range(n_trunk):
            tparams.append((refs[idx], refs[idx + 1]))
            idx += 2
        bias_ref = refs[idx]; idx += 1           # (1, 1) scalar in SMEM
        out_ref = refs[idx]                      # (TB, TP)

        # ---- Trunk MLP in transposed form: activations (TB, H, TP), TP on
        # lanes (lane-dense GELU, lane-dense MXU outputs). f32 accumulation.
        t = trunk_ref[...].astype(compute_dtype)
        for wT_ref, bcol_ref in tparams:
            w = wT_ref[...].astype(compute_dtype)            # (Hout, Hin)
            wb = jnp.broadcast_to(w, (tb,) + w.shape)        # (TB, Hout, Hin)
            acc = jax.lax.dot_general(
                wb, t, (((2,), (1,)), ((0,), (0,))),
                preferred_element_type=jnp.float32)          # (TB, Hout, TP)
            t = _gelu_f32(acc + bcol_ref[...]).astype(compute_dtype)

        # ---- einsum('bl,blp->bp'): batched matvec, K=L on sublanes of t,
        # N=TP lane-dense -> no hidden transposes; ~3% of the FLOPs.
        h3 = h_ref[...].astype(compute_dtype).reshape(tb, 1, latent)
        o = jax.lax.dot_general(
            h3, t, (((2,), (1,)), ((0,), (0,))),
            preferred_element_type=jnp.float32)              # (TB, 1, TP)
        out_ref[...] = (o.reshape(tb, tp) + bias_ref[0, 0]).astype(out_ref.dtype)

    return kernel


def _mlp_xla(x, params, compute_dtype):
    """Plain-XLA MLP with GELU after every layer (final_activation=True)."""
    for W, b in params:
        y = jnp.dot(x.astype(compute_dtype), W.astype(compute_dtype),
                    preferred_element_type=jnp.float32)
        x = jax.nn.gelu(y + b, approximate=False)
    return x


def deeponet_forward(branch_input, trunk_input, branch_params, trunk_params,
                     bias, *, compute_dtype=jnp.float32,
                     tile_batch=8, tile_points=1024):
    B, P, Dt = trunk_input.shape
    latent = trunk_params[-1][0].shape[1]
    assert branch_params[-1][0].shape[1] == latent
    c_dt = jnp.dtype(compute_dtype)

    # ---- Branch MLP hoisted to XLA (tiny; removes serialized recompute + the
    # scratch carry across a grid axis the old kernel needed).
    h = _mlp_xla(branch_input, branch_params, compute_dtype).astype(jnp.float32)

    # ---- Tiles: TP lane-dense (multiple of 128), clamped to the padded size.
    TP = int(min(int(tile_points), _round_up(P, 128)))
    TP = max(128, _round_up(TP, 128))
    TB = max(1, int(min(int(tile_batch), B)))
    B_pad = _round_up(B, TB)
    P_pad = _round_up(P, TP)

    # ---- Trunk input transposed so P is the minor (lane) dim: (B, Dt, P).
    # Stored directly in the compute dtype (bf16 path halves HBM traffic).
    trunk_t = jnp.zeros((B_pad, Dt, P_pad), c_dt).at[:B, :, :P].set(
        jnp.transpose(trunk_input, (0, 2, 1)).astype(c_dt))
    h_pad = jnp.zeros((B_pad, latent), jnp.float32).at[:B].set(h)

    # Trunk weights transposed to (out, in); layer biases as (out, 1) f32 cols.
    flat_params = []
    for W, b in trunk_params:
        flat_params.append(jnp.transpose(W).astype(c_dt))
        flat_params.append(jnp.reshape(b, (-1, 1)).astype(jnp.float32))
    bias_smem = jnp.reshape(bias, (1, 1)).astype(jnp.float32)

    kernel = _make_trunk_kernel(len(trunk_params), TB, TP, latent, compute_dtype)

    in_specs = [
        pl.BlockSpec((TB, Dt, TP), lambda b, p: (b, 0, p)),   # trunk tile
        pl.BlockSpec((TB, latent), lambda b, p: (b, 0)),      # branch output
    ]
    for arr in flat_params:                                    # VMEM-resident
        in_specs.append(pl.BlockSpec(arr.shape, lambda b, p: (0, 0)))
    in_specs.append(pl.BlockSpec(memory_space=pltpu.MemorySpace.SMEM))  # bias

    out_specs = pl.BlockSpec((TB, TP), lambda b, p: (b, p))
    grid = (B_pad // TB, P_pad // TP)

    # ---- VMEM budget (honest w.r.t. lane/sublane padding of the new layout).
    max_h = max([Dt] + [w.shape[1] for w, _ in trunk_params])
    param_bytes = 0
    for arr in flat_params:
        r, c = arr.shape
        param_bytes += _round_up(r, 8) * _round_up(c, 128) * 4
    block_bytes = (TB * 8 * TP * 4                              # trunk tile
                   + _round_up(TB, 8) * _round_up(latent, 128) * 4   # h tile
                   + TB * TP * 4)                               # out tile
    act_bytes = 8 * TB * max_h * TP * 4        # live f32 GELU intermediates
    vmem_limit = int(min(max(2 * (param_bytes + block_bytes) + act_bytes
                             + (8 << 20), 32 << 20), 64 << 20))

    # ---- advisory cost estimate (branch MLP runs outside the kernel).
    tr_dims = [Dt] + [w.shape[1] for w, _ in trunk_params]
    flops = (B_pad * P_pad * sum(2 * tr_dims[i] * tr_dims[i + 1]
                                 for i in range(len(tr_dims) - 1))
             + 2 * B_pad * P_pad * latent)
    transcendentals = B_pad * P_pad * sum(tr_dims[1:])
    bytes_accessed = (int(trunk_t.size) * trunk_t.dtype.itemsize
                      + int(h_pad.size) * 4 + B_pad * P_pad * 4
                      + sum(int(a.size) * a.dtype.itemsize for a in flat_params))

    out = pl.pallas_call(
        kernel,
        out_shape=jax.ShapeDtypeStruct((B_pad, P_pad), jnp.float32),
        grid_spec=pltpu.PrefetchScalarGridSpec(
            num_scalar_prefetch=0,
            grid=grid,
            in_specs=in_specs,
            out_specs=out_specs,
        ),
        compiler_params=pltpu.CompilerParams(
            dimension_semantics=("parallel", "parallel"),
            vmem_limit_bytes=vmem_limit,
        ),
        cost_estimate=pl.CostEstimate(
            flops=int(flops),
            transcendentals=int(transcendentals),
            bytes_accessed=int(bytes_accessed)),
    )(trunk_t, h_pad, *flat_params, bias_smem)

    return out[:B, :P]


def init_mlp_params(key, layer_sizes):
    """Deterministic PyTorch-Linear-style init: U(-1/sqrt(fan_in), 1/sqrt(fan_in))."""
    params = []
    for i in range(len(layer_sizes) - 1):
        key, kw, kb = jax.random.split(key, 3)
        fan_in, fan_out = layer_sizes[i], layer_sizes[i + 1]
        bound = 1.0 / math.sqrt(fan_in)
        W = jax.random.uniform(kw, (fan_in, fan_out), jnp.float32, -bound, bound)
        b = jax.random.uniform(kb, (1, fan_out), jnp.float32, -bound, bound)
        params.append((W, b))
    return params


def deeponet_reference(branch_input, trunk_input, branch_params, trunk_params,
                       bias, compute_dtype=jnp.float32):
    """Pure-JAX reference mirroring the PyTorch forward (eval mode)."""
    def mlp(x, params):
        for W, b in params:
            y = jnp.dot(x.astype(compute_dtype), W.astype(compute_dtype),
                        preferred_element_type=jnp.float32)
            x = jax.nn.gelu(y + b, approximate=False)
        return x
    B, P, Dt = trunk_input.shape
    h = mlp(branch_input, branch_params)                               # (B, L)
    t = mlp(trunk_input.reshape(-1, Dt), trunk_params).reshape(B, P, -1)
    out = jnp.einsum('bl,bpl->bp', h.astype(compute_dtype),
                     t.astype(compute_dtype),
                     preferred_element_type=jnp.float32)
    return out + bias[0]


if __name__ == "__main__":
    key = jax.random.PRNGKey(0)
    branch_input_dim, trunk_input_dim = 16, 2
    branch_layers = [32, 32]
    trunk_layers = [32, 32]

    k1, k2, k3, k4, k5, k6 = jax.random.split(key, 6)
    branch_params = init_mlp_params(k1, [branch_input_dim] + branch_layers)
    trunk_params = init_mlp_params(k2, [trunk_input_dim] + trunk_layers)

    # ---- test 1: small shapes, f32 compute, single-tile grid -----------------
    B, P = 2, 8
    bias0 = jnp.zeros((1,), jnp.float32)          # nn.Parameter(torch.zeros(1))
    branch_input = jax.random.normal(k3, (B, branch_input_dim), jnp.float32)
    trunk_input = jax.random.normal(k4, (B, P, trunk_input_dim), jnp.float32)

    out = deeponet_forward(branch_input, trunk_input,
                           branch_params, trunk_params, bias0)
    jax.block_until_ready(out)
    ref = deeponet_reference(branch_input, trunk_input,
                             branch_params, trunk_params, bias0)
    assert out.shape == (B, P)
    assert jnp.allclose(out, ref, atol=1e-2, rtol=1e-2), (
        float(jnp.max(jnp.abs(out - ref))))

    # ---- test 2: multi-tile grid (2 batch tiles x 2 point tiles), padding,
    #              bf16 MXU path, nonzero bias ---------------------------------
    B2, P2 = 10, 200
    bias1 = jnp.full((1,), 0.25, jnp.float32)
    branch_input2 = jax.random.normal(k5, (B2, branch_input_dim), jnp.float32)
    trunk_input2 = jax.random.normal(k6, (B2, P2, trunk_input_dim), jnp.float32)

    out2 = deeponet_forward(branch_input2, trunk_input2,
                            branch_params, trunk_params, bias1,
                            compute_dtype=jnp.bfloat16, tile_points=128)
    jax.block_until_ready(out2)
    ref2 = deeponet_reference(branch_input2, trunk_input2,
                              branch_params, trunk_params, bias1,
                              compute_dtype=jnp.bfloat16)
    assert out2.shape == (B2, P2)
    assert jnp.allclose(out2, ref2, atol=2.5e-2, rtol=2.5e-2), (
        float(jnp.max(jnp.abs(out2 - ref2))))

    # ---- test 3: same shapes, f32, default (larger) point tiles --------------
    out3 = deeponet_forward(branch_input2, trunk_input2,
                            branch_params, trunk_params, bias1)
    jax.block_until_ready(out3)
    ref3 = deeponet_reference(branch_input2, trunk_input2,
                              branch_params, trunk_params, bias1)
    assert jnp.allclose(out3, ref3, atol=1e-2, rtol=1e-2), (
        float(jnp.max(jnp.abs(out3 - ref3))))

    print("KERNEL_OK")
</pallas_src>

<mosaic_0001>
module attributes {stable_mosaic.version = 11 : i64} {
  func.func @kernel(%arg0: i32, %arg1: i32, %arg2: memref<2x2x128xf32, #tpu.memory_space<vmem>>, %arg3: memref<2x32xf32, #tpu.memory_space<vmem>>, %arg4: memref<32x2xf32, #tpu.memory_space<vmem>>, %arg5: memref<32x1xf32, #tpu.memory_space<vmem>>, %arg6: memref<32x32xf32, #tpu.memory_space<vmem>>, %arg7: memref<32x1xf32, #tpu.memory_space<vmem>>, %arg8: memref<1x1xf32, #tpu.memory_space<smem>>, %arg9: memref<2x128xf32, #tpu.memory_space<vmem>>) attributes {dimension_semantics = [#tpu.dimension_semantics<parallel>, #tpu.dimension_semantics<parallel>], iteration_bounds = array<i64: 1, 1>, scalar_prefetch = 0 : i64, scratch_operands = 0 : i64, tpu.core_type = #tpu.core_type<tc>, window_params = [{transform_indices = @transform_0, window_bounds = array<i64: 2, 2, 128>}, {transform_indices = @transform_1, window_bounds = array<i64: 2, 32>}, {pipeline_mode = #tpu.pipeline_mode<synchronous>, transform_indices = @transform_2, window_bounds = array<i64: 32, 2>}, {pipeline_mode = #tpu.pipeline_mode<synchronous>, transform_indices = @transform_3, window_bounds = array<i64: 32, 1>}, {pipeline_mode = #tpu.pipeline_mode<synchronous>, transform_indices = @transform_4, window_bounds = array<i64: 32, 32>}, {pipeline_mode = #tpu.pipeline_mode<synchronous>, transform_indices = @transform_5, window_bounds = array<i64: 32, 1>}, {transform_indices = @transform_6, window_bounds = array<i64: 1, 1>}, {transform_indices = @transform_7, window_bounds = array<i64: 2, 128>}]} {
    %c0 = arith.constant 0 : index
    %c0_0 = arith.constant 0 : index
    %c0_1 = arith.constant 0 : index
    %0 = vector.load %arg2[%c0, %c0_0, %c0_1] : memref<2x2x128xf32, #tpu.memory_space<vmem>>, vector<2x2x128xf32>
    %c0_2 = arith.constant 0 : index
    %c0_3 = arith.constant 0 : index
    %1 = vector.load %arg4[%c0_2, %c0_3] : memref<32x2xf32, #tpu.memory_space<vmem>>, vector<32x2xf32>
    %2 = vector.shape_cast %1 : vector<32x2xf32> to vector<1x32x2xf32>
    %3 = vector.broadcast %2 : vector<1x32x2xf32> to vector<2x32x2xf32>
    %cst = arith.constant dense<0.000000e+00> : vector<2x32x128xf32>
    %4 = tpu.matmul %3, %0, %cst {dimension_numbers = #tpu.dot_dimension_numbers<[2], [1], [1], [2], [0, 0, 0, 1, 1, 2], [0], [0]>} : vector<2x32x2xf32>, vector<2x2x128xf32>, vector<2x32x128xf32> -> vector<2x32x128xf32>
    %c0_4 = arith.constant 0 : index
    %c0_5 = arith.constant 0 : index
    %5 = vector.load %arg5[%c0_4, %c0_5] : memref<32x1xf32, #tpu.memory_space<vmem>>, vector<32x1xf32>
    %6 = vector.shape_cast %5 : vector<32x1xf32> to vector<1x32x1xf32>
    %7 = vector.broadcast %6 : vector<1x32x1xf32> to vector<2x32x128xf32>
    %8 = arith.addf %4, %7 : vector<2x32x128xf32>
    %cst_6 = arith.constant 0.707106769 : f32
    %9 = vector.broadcast %cst_6 : f32 to vector<2x32x128xf32>
    %10 = arith.mulf %8, %9 : vector<2x32x128xf32>
    %11 = math.absf %10 : vector<2x32x128xf32>
    %cst_7 = arith.constant 0.000000e+00 : f32
    %12 = vector.broadcast %cst_7 : f32 to vector<2x32x128xf32>
    %13 = arith.cmpf oge, %10, %12 : vector<2x32x128xf32>
    %cst_8 = arith.constant 1.000000e+00 : f32
    %cst_9 = arith.constant -1.000000e+00 : f32
    %14 = vector.broadcast %cst_8 : f32 to vector<2x32x128xf32>
    %15 = vector.broadcast %cst_9 : f32 to vector<2x32x128xf32>
    %16 = arith.select %13, %14, %15 : vector<2x32x128xi1>, vector<2x32x128xf32>
    %cst_10 = arith.constant 0.327591091 : f32
    %17 = vector.broadcast %cst_10 : f32 to vector<2x32x128xf32>
    %18 = arith.mulf %17, %11 : vector<2x32x128xf32>
    %cst_11 = arith.constant 1.000000e+00 : f32
    %19 = vector.broadcast %cst_11 : f32 to vector<2x32x128xf32>
    %20 = arith.addf %19, %18 : vector<2x32x128xf32>
    %21 = tpu.reciprocal %20 {approx = true} : vector<2x32x128xf32> -> vector<2x32x128xf32>
    %cst_12 = arith.constant 1.06140542 : f32
    %22 = vector.broadcast %cst_12 : f32 to vector<2x32x128xf32>
    %23 = arith.mulf %22, %21 : vector<2x32x128xf32>
    %cst_13 = arith.constant 1.45315206 : f32
    %24 = vector.broadcast %cst_13 : f32 to vector<2x32x128xf32>
    %25 = arith.subf %23, %24 : vector<2x32x128xf32>
    %26 = arith.mulf %25, %21 : vector<2x32x128xf32>
    %cst_14 = arith.constant 1.42141378 : f32
    %27 = vector.broadcast %cst_14 : f32 to vector<2x32x128xf32>
    %28 = arith.addf %26, %27 : vector<2x32x128xf32>
    %29 = arith.mulf %28, %21 : vector<2x32x128xf32>
    %cst_15 = arith.constant 0.284496725 : f32
    %30 = vector.broadcast %cst_15 : f32 to vector<2x32x128xf32>
    %31 = arith.subf %29, %30 : vector<2x32x128xf32>
    %32 = arith.mulf %31, %21 : vector<2x32x128xf32>
    %cst_16 = arith.constant 0.254829586 : f32
    %33 = vector.broadcast %cst_16 : f32 to vector<2x32x128xf32>
    %34 = arith.addf %32, %33 : vector<2x32x128xf32>
    %35 = arith.mulf %34, %21 : vector<2x32x128xf32>
    %cst_17 = arith.constant 0.000000e+00 : f32
    %36 = vector.broadcast %cst_17 : f32 to vector<2x32x128xf32>
    %37 = arith.subf %36, %11 : vector<2x32x128xf32>
    %38 = arith.mulf %37, %11 : vector<2x32x128xf32>
    %39 = math.exp %38 : vector<2x32x128xf32>
    %40 = arith.mulf %35, %39 : vector<2x32x128xf32>
    %cst_18 = arith.constant 1.000000e+00 : f32
    %41 = vector.broadcast %cst_18 : f32 to vector<2x32x128xf32>
    %42 = arith.subf %41, %40 : vector<2x32x128xf32>
    %43 = arith.mulf %16, %42 : vector<2x32x128xf32>
    %cst_19 = arith.constant 5.000000e-01 : f32
    %44 = vector.broadcast %cst_19 : f32 to vector<2x32x128xf32>
    %45 = arith.mulf %44, %8 : vector<2x32x128xf32>
    %cst_20 = arith.constant 1.000000e+00 : f32
    %46 = vector.broadcast %cst_20 : f32 to vector<2x32x128xf32>
    %47 = arith.addf %46, %43 : vector<2x32x128xf32>
    %48 = arith.mulf %45, %47 : vector<2x32x128xf32>
    %c0_21 = arith.constant 0 : index
    %c0_22 = arith.constant 0 : index
    %49 = vector.load %arg6[%c0_21, %c0_22] : memref<32x32xf32, #tpu.memory_space<vmem>>, vector<32x32xf32>
    %50 = vector.shape_cast %49 : vector<32x32xf32> to vector<1x32x32xf32>
    %51 = vector.broadcast %50 : vector<1x32x32xf32> to vector<2x32x32xf32>
    %cst_23 = arith.constant dense<0.000000e+00> : vector<2x32x128xf32>
    %52 = tpu.matmul %51, %48, %cst_23 {dimension_numbers = #tpu.dot_dimension_numbers<[2], [1], [1], [2], [0, 0, 0, 1, 1, 2], [0], [0]>} : vector<2x32x32xf32>, vector<2x32x128xf32>, vector<2x32x128xf32> -> vector<2x32x128xf32>
    %c0_24 = arith.constant 0 : index
    %c0_25 = arith.constant 0 : index
    %53 = vector.load %arg7[%c0_24, %c0_25] : memref<32x1xf32, #tpu.memory_space<vmem>>, vector<32x1xf32>
    %54 = vector.shape_cast %53 : vector<32x1xf32> to vector<1x32x1xf32>
    %55 = vector.broadcast %54 : vector<1x32x1xf32> to vector<2x32x128xf32>
    %56 = arith.addf %52, %55 : vector<2x32x128xf32>
    %cst_26 = arith.constant 0.707106769 : f32
    %57 = vector.broadcast %cst_26 : f32 to vector<2x32x128xf32>
    %58 = arith.mulf %56, %57 : vector<2x32x128xf32>
    %59 = math.absf %58 : vector<2x32x128xf32>
    %cst_27 = arith.constant 0.000000e+00 : f32
    %60 = vector.broadcast %cst_27 : f32 to vector<2x32x128xf32>
    %61 = arith.cmpf oge, %58, %60 : vector<2x32x128xf32>
    %cst_28 = arith.constant 1.000000e+00 : f32
    %cst_29 = arith.constant -1.000000e+00 : f32
    %62 = vector.broadcast %cst_28 : f32 to vector<2x32x128xf32>
    %63 = vector.broadcast %cst_29 : f32 to vector<2x32x128xf32>
    %64 = arith.select %61, %62, %63 : vector<2x32x128xi1>, vector<2x32x128xf32>
    %cst_30 = arith.constant 0.327591091 : f32
    %65 = vector.broadcast %cst_30 : f32 to vector<2x32x128xf32>
    %66 = arith.mulf %65, %59 : vector<2x32x128xf32>
    %cst_31 = arith.constant 1.000000e+00 : f32
    %67 = vector.broadcast %cst_31 : f32 to vector<2x32x128xf32>
    %68 = arith.addf %67, %66 : vector<2x32x128xf32>
    %69 = tpu.reciprocal %68 {approx = true} : vector<2x32x128xf32> -> vector<2x32x128xf32>
    %cst_32 = arith.constant 1.06140542 : f32
    %70 = vector.broadcast %cst_32 : f32 to vector<2x32x128xf32>
    %71 = arith.mulf %70, %69 : vector<2x32x128xf32>
    %cst_33 = arith.constant 1.45315206 : f32
    %72 = vector.broadcast %cst_33 : f32 to vector<2x32x128xf32>
    %73 = arith.subf %71, %72 : vector<2x32x128xf32>
    %74 = arith.mulf %73, %69 : vector<2x32x128xf32>
    %cst_34 = arith.constant 1.42141378 : f32
    %75 = vector.broadcast %cst_34 : f32 to vector<2x32x128xf32>
    %76 = arith.addf %74, %75 : vector<2x32x128xf32>
    %77 = arith.mulf %76, %69 : vector<2x32x128xf32>
    %cst_35 = arith.constant 0.284496725 : f32
    %78 = vector.broadcast %cst_35 : f32 to vector<2x32x128xf32>
    %79 = arith.subf %77, %78 : vector<2x32x128xf32>
    %80 = arith.mulf %79, %69 : vector<2x32x128xf32>
    %cst_36 = arith.constant 0.254829586 : f32
    %81 = vector.broadcast %cst_36 : f32 to vector<2x32x128xf32>
    %82 = arith.addf %80, %81 : vector<2x32x128xf32>
    %83 = arith.mulf %82, %69 : vector<2x32x128xf32>
    %cst_37 = arith.constant 0.000000e+00 : f32
    %84 = vector.broadcast %cst_37 : f32 to vector<2x32x128xf32>
    %85 = arith.subf %84, %59 : vector<2x32x128xf32>
    %86 = arith.mulf %85, %59 : vector<2x32x128xf32>
    %87 = math.exp %86 : vector<2x32x128xf32>
    %88 = arith.mulf %83, %87 : vector<2x32x128xf32>
    %cst_38 = arith.constant 1.000000e+00 : f32
    %89 = vector.broadcast %cst_38 : f32 to vector<2x32x128xf32>
    %90 = arith.subf %89, %88 : vector<2x32x128xf32>
    %91 = arith.mulf %64, %90 : vector<2x32x128xf32>
    %cst_39 = arith.constant 5.000000e-01 : f32
    %92 = vector.broadcast %cst_39 : f32 to vector<2x32x128xf32>
    %93 = arith.mulf %92, %56 : vector<2x32x128xf32>
    %cst_40 = arith.constant 1.000000e+00 : f32
    %94 = vector.broadcast %cst_40 : f32 to vector<2x32x128xf32>
    %95 = arith.addf %94, %91 : vector<2x32x128xf32>
    %96 = arith.mulf %93, %95 : vector<2x32x128xf32>
    %c0_41 = arith.constant 0 : index
    %c0_42 = arith.constant 0 : index
    %97 = vector.load %arg3[%c0_41, %c0_42] : memref<2x32xf32, #tpu.memory_space<vmem>>, vector<2x32xf32>
    %98 = vector.shape_cast %97 : vector<2x32xf32> to vector<2x1x32xf32>
    %cst_43 = arith.constant dense<0.000000e+00> : vector<2x1x128xf32>
    %99 = tpu.matmul %98, %96, %cst_43 {dimension_numbers = #tpu.dot_dimension_numbers<[2], [1], [1], [2], [0, 0, 0, 1, 1, 2], [0], [0]>} : vector<2x1x32xf32>, vector<2x32x128xf32>, vector<2x1x128xf32> -> vector<2x1x128xf32>
    %100 = vector.shape_cast %99 : vector<2x1x128xf32> to vector<2x128xf32>
    %c0_44 = arith.constant 0 : index
    %c0_45 = arith.constant 0 : index
    %101 = memref.load %arg8[%c0_44, %c0_45] : memref<1x1xf32, #tpu.memory_space<smem>>
    %102 = vector.broadcast %101 : f32 to vector<2x128xf32>
    %103 = arith.addf %100, %102 : vector<2x128xf32>
    %c0_46 = arith.constant 0 : index
    %c0_47 = arith.constant 0 : index
    %104 = vector.load %arg9[%c0_46, %c0_47] : memref<2x128xf32, #tpu.memory_space<vmem>>, vector<2x128xf32>
    tpu.vector_store %arg9[%c0_46, %c0_47], %103 {strides = array<i32>} : memref<2x128xf32, #tpu.memory_space<vmem>>, vector<2x128xf32>,
    return
  }
  func.func @transform_0(%arg0: i32, %arg1: i32) -> (i32, i32, i32) {
    %c0_i32 = arith.constant 0 : i32
    %c0_i32_0 = arith.constant 0 : i32
    return %arg0, %c0_i32, %arg1 : i32, i32, i32
  }
  func.func @transform_1(%arg0: i32, %arg1: i32) -> (i32, i32) {
    %c0_i32 = arith.constant 0 : i32
    %c0_i32_0 = arith.constant 0 : i32
    return %arg0, %c0_i32 : i32, i32
  }
  func.func @transform_2(%arg0: i32, %arg1: i32) -> (i32, i32) {
    %c0_i32 = arith.constant 0 : i32
    %c0_i32_0 = arith.constant 0 : i32
    %c0_i32_1 = arith.constant 0 : i32
    return %c0_i32, %c0_i32_0 : i32, i32
  }
  func.func @transform_3(%arg0: i32, %arg1: i32) -> (i32, i32) {
    %c0_i32 = arith.constant 0 : i32
    %c0_i32_0 = arith.constant 0 : i32
    %c0_i32_1 = arith.constant 0 : i32
    return %c0_i32, %c0_i32_0 : i32, i32
  }
  func.func @transform_4(%arg0: i32, %arg1: i32) -> (i32, i32) {
    %c0_i32 = arith.constant 0 : i32
    %c0_i32_0 = arith.constant 0 : i32
    %c0_i32_1 = arith.constant 0 : i32
    return %c0_i32, %c0_i32_0 : i32, i32
  }
  func.func @transform_5(%arg0: i32, %arg1: i32) -> (i32, i32) {
    %c0_i32 = arith.constant 0 : i32
    %c0_i32_0 = arith.constant 0 : i32
    %c0_i32_1 = arith.constant 0 : i32
    return %c0_i32, %c0_i32_0 : i32, i32
  }
  func.func @transform_6(%arg0: i32, %arg1: i32) -> (i32, i32) {
    %c0_i32 = arith.constant 0 : i32
    %c0_i32_0 = arith.constant 0 : i32
    %c0_i32_1 = arith.constant 0 : i32
    return %c0_i32, %c0_i32_0 : i32, i32
  }
  func.func @transform_7(%arg0: i32, %arg1: i32) -> (i32, i32) {
    %c0_i32 = arith.constant 0 : i32
    return %arg0, %arg1 : i32, i32
  }
}

</mosaic_0001>

<bundles_post_ra>
// kernel: tpu_custom_call.1
= control target key start
LH: loop header
LB: loop body
LE: loop exit
PB: predicated region body
PF: predicated region fallthrough
CT: control target
= control target key end

     0   :  { %vm71_vm0 = vcmask 1041408   ;;  %vm58_vm1 = vcmask 15360   ;;  %s1766_s0 = inlined_call_operand.vmem [shape: f32[2,2,128], index: 0, kind: input, shape index: {}]   ;;  %s1767_s1 = inlined_call_operand.vmem [shape: f32[2,32], index: 1, kind: input, shape index: {}]   ;;  %s1768_s2 = inlined_call_operand.vmem [shape: f32[32,2], index: 2, kind: input, shape index: {}]   ;;  %s1769_s3 = inlined_call_operand.vmem [shape: f32[32,1], index: 3, kind: input, shape index: {}]   ;;  %s1770_s4 = inlined_call_operand.vmem [shape: f32[32,32], index: 4, kind: input, shape index: {}]   ;;  %s1771_s5 = inlined_call_operand.vmem [shape: f32[32,1], index: 5, kind: input, shape index: {}]   ;;  %s1772_s6 = inlined_call_operand.<no memory space> [shape: f32[1,1], index: 6, kind: input, shape index: {}]   ;;  %s1773_s7 = inlined_call_operand.hbm [shape: f32[2,128], index: 7, kind: output, shape index: {}]  }
   0x1   :  { %v28_v0 = vld [vmem:[%s1766_s0] sm:$0x3]  ;;  %v29_v1 = vld [vmem:[%s1766_s0 + $0x2] sm:$0x3]  ;;  %v31_v3 = vld [vmem:[%s1768_s2 + $0x8] sm:$0xff] }
   0x2   :  { %v30_v2 = vld [vmem:[%s1768_s2] sm:$0xff]  ;;  %1157 = vmatprep.subr.msk.mxu0 %vm71_vm0, %v28_v0  ;;  %1165 = vmatprep.subr.msk.mxu1 %vm71_vm0, %v29_v1  ;;  %v32_v4 = vld [vmem:[%s1768_s2 + $0x10] sm:$0xff] }
   0x3   :  { %1158 = vmatpush3.msk.msra.mxu0 %vm71_vm0, %v28_v0  ;;  %1159 = vmatprep.mubr.msk.f32.mxu0 %vm58_vm1, %v30_v2  ;;  %v34_v5 = vld [vmem:[%s1769_s3] sm:$0xff]  ;;  %v36_v6 = vld [vmem:[%s1769_s3 + $0x10] sm:$0xff] }
   0x4   :  { %1166 = vmatpush3.msk.msra.mxu1 %vm71_vm0, %v29_v1  ;;  %1167 = vmatprep.mubr.msk.f32.mxu1 %vm58_vm1, %v30_v2 }
   0x5   :  { %1160 = vmatmul.mubr.msk.f32.vlgmr.msra.gmra.mrb[0].mxu0 %vm58_vm1, %v31_v3  ;;  %1168 = vmatmul.mubr.msk.f32.vlgmr.msra.gmra.mrb[0].mxu1 %vm58_vm1, %v31_v3 }
   0x6   :  { %13 = vsyncpa [#allocation4], 0  ;;  %1162 = vmatprep.mubr.msk.f32.mxu0 %vm58_vm1, %v32_v4  ;;  %1170 = vmatprep.mubr.msk.f32.mxu1 %vm58_vm1, %v32_v4  ;;  %v33_v7 = vld [vmem:[%s1768_s2 + $0x18] sm:$0xff]  ;;  %v1348_v8 = vmov 0   ;;  %v35_v9 = vld [vmem:[%s1769_s3 + $0x8] sm:$0xff]  ;;  %vm484_vm2 = vcmask 261120  }
   0x7   :  { %1258 = vset.pattern.permute.xlu0 %v1348_v8  ;;  %1259 = vset.pattern.permute.xlu1 %v1348_v8  ;;  %v37_v10 = vld [vmem:[%s1769_s3 + $0x18] sm:$0xff]  ;;  %v460_v11 = vld [vmem:[%s1771_s5] sm:$0xff]  ;;  %v461_v12 = vld [vmem:[%s1771_s5 + $0x8] sm:$0xff]  ;;  %v1349_v3 = vmov -1.0   ;;  %vm1351_vm11 = vmmov 0   ;;  %s1354_s11 = smov [#allocation3]  }
   0x8   :  { %40 = vperm.xlu0 %1258, %v34_v5   ;;  %50 = vperm.xlu1 %1259, %v36_v6   ;;  %v462_v13 = vld [vmem:[%s1771_s5 + $0x10] sm:$0xff]  ;;  %v463_v14 = vld [vmem:[%s1771_s5 + $0x18] sm:$0xff]  ;;  %v456_v15 = vld [vmem:[%s1770_s4] sm:$0xff]  ;;  %s1060_s12 = sshll.u32 %s1354_s11, 4  ;;  %s1061_s12 = int_to_ptr.vmem [resolvable:$true] %s1060_s12 }
   0x9   :  { %1163 = vmatmul.mubr.msk.f32.gmra.mrb[2].mxu0 %vm58_vm1, %v33_v7  ;;  %1171 = vmatmul.mubr.msk.f32.gmra.mrb[2].mxu1 %vm58_vm1, %v33_v7  ;;  %s1324_s13 = scalar_lea.vmem %s1061_s12, 32  ;;  %p1329_p1 = scmp.lt.s32.totalorder %s1061_s12, %s1061_s12 }
   0xa   :  { %1181 = vmatprep.mubr.msk.f32.mxu0 %vm484_vm2, %v456_v15  ;;  %1195 = vmatprep.mubr.msk.f32.mxu1 %vm484_vm2, %v456_v15  ;;  %p1325_p0 = scmp.ne.s32.totalorder %s1061_s12, %s1324_s13  ;;  %p1330_p2 = scmp.lt.s32.totalorder %s1324_s13, %s1324_s13 }
   0xc   :  { %45 = vperm.xlu0 %1258, %v35_v9   ;;  %55 = vperm.xlu1 %1259, %v37_v10   ;;  %p1331_p3 = por %p1330_p2, %p1329_p1 }
   0xe   :  { %p1332_p4 = pnand %p1331_p3, %p1325_p0 }
  0x10   :  { %466 = vperm.xlu0 %1258, %v460_v11   ;;  %471 = vperm.xlu1 %1259, %v461_v12  }
  0x14   :  { %476 = vperm.xlu0 %1258, %v462_v13   ;;  %481 = vperm.xlu1 %1259, %v463_v14  }
  0x87   :  { %v41_v16 = vpop.permute.xlu0 %40  ;;  %v51_v32 = vpop.permute.xlu1 %50 }
  0x8b   :  { %v46_v17 = vpop.permute.xlu0 %45  ;;  %v56_v46 = vpop.permute.xlu1 %55 }
  0xd8   :  { %v1161_v18 = vpop.f32.mrb[0].mxu0  ;;  %v1169_v19 = vpop.f32.mrb[0].mxu1 }
  0xd9   :  { %v147_v20 = vadd.f32 %v1161_v18, %v46_v17  ;;  %v235_v21 = vadd.f32 %v1169_v19, %v46_v17  ;;  %v141_v22 = vpop.f32.mrb[1].mxu0  ;;  %v229_v23 = vpop.f32.mrb[1].mxu1 }
  0xda   :  { %v142_v24 = vadd.f32 %v141_v22, %v41_v16  ;;  %v230_v25 = vadd.f32 %v229_v23, %v41_v16 }
  0xdb   :  { %v249_v26 = vmul.f32 0.70710677, %v147_v20  ;;  %v253_v27 = vmul.f32 0.70710677, %v235_v21  ;;  %v1459_v51 = vmul.f32 0.5, %v147_v20  ;;  %v1461_v52 = vmul.f32 0.5, %v235_v21 }
  0xdc   :  { %v248_v28 = vmul.f32 0.70710677, %v142_v24  ;;  %v1450_v29 = vmul.f32 0.70710677, %v230_v25  ;;  %v1164_v34 = vpop.f32.mrb[2].mxu0  ;;  %v1172_v41 = vpop.f32.mrb[2].mxu1 }
  0xdd   :  { %v257_v30 = vand.u32 2147483647, %v249_v26  ;;  %v261_v31 = vand.u32 2147483647, %v253_v27  ;;  %v151_v42 = vpop.f32.mrb[3].mxu0  ;;  %v239_v44 = vpop.f32.mrb[3].mxu1  ;;  %v1453_v48 = vadd.f32 %v1164_v34, %v56_v46  ;;  %v1455_v49 = vadd.f32 %v1172_v41, %v56_v46 }
  0xde   :  { %v256_v33 = vand.u32 2147483647, %v248_v28  ;;  %v260_v38 = vand.u32 2147483647, %v1450_v29  ;;  %v1457_v50 = vadd.f32 %v151_v42, %v51_v32  ;;  %v1469_v57 = vmul.f32 0.5, %v142_v24 }
  0xdf   :  { %v281_v35 = vmul.f32 0.3275911, %v257_v30  ;;  %v285_v36 = vmul.f32 0.3275911, %v261_v31  ;;  %v1464_v53 = vmul.f32 0.70710677, %v1453_v48  ;;  %v1490_v12 = vadd.f32 %v239_v44, %v51_v32 }
  0xe0   :  { %v280_v37 = vmul.f32 0.3275911, %v256_v33  ;;  %v284_v43 = vmul.f32 0.3275911, %v260_v38  ;;  %v1467_v54 = vmul.f32 0.70710677, %v1455_v49 }
  0xe1   :  { %v289_v39 = vadd.f32 1.0, %v281_v35  ;;  %v293_v40 = vadd.f32 1.0, %v285_v36  ;;  %v377_v55 = vsub.f32 0.0, %v257_v30  ;;  %v381_v56 = vsub.f32 0.0, %v261_v31 }
  0xe2   :  { %v288_v45 = vadd.f32 1.0, %v280_v37  ;;  %v292_v47 = vadd.f32 1.0, %v284_v43  ;;  %v1472_v58 = vmul.f32 0.70710677, %v1457_v50  ;;  %vm265_vm3 = vcmp.ge.f32.partialorder %v249_v26, 0.0 }
  0xe3   :  { %1260 = vrcp.f32 %v289_v39  ;;  %v259_v59 = vand.u32 2147483647, %v1464_v53  ;;  %v263_v60 = vand.u32 2147483647, %v1467_v54  ;;  %vm269_vm4 = vcmp.ge.f32.partialorder %v253_v27, 0.0 }
  0xe4   :  { %1262 = vrcp.f32 %v293_v40  ;;  %v376_v61 = vsub.f32 0.0, %v256_v33  ;;  %v380_v62 = vsub.f32 0.0, %v260_v38  ;;  %v1477_v63 = vand.u32 2147483647, %v1472_v58 }
  0xe5   :  { %1264 = vrcp.f32 %v288_v45  ;;  %vm264_vm5 = vcmp.ge.f32.partialorder %v248_v28, 0.0  ;;  %v1479_v0 = vmul.f32 0.5, %v230_v25  ;;  %v283_v1 = vmul.f32 0.3275911, %v259_v59 }
  0xe6   :  { %1266 = vrcp.f32 %v292_v47  ;;  %v287_v2 = vmul.f32 0.3275911, %v263_v60  ;;  %v1482_v4 = vsel %vm265_vm3, 1.0, %v1349_v3  ;;  %v385_v5 = vmul.f32 %v377_v55, %v257_v30 }
  0xe7   :  { %v389_v6 = vmul.f32 %v381_v56, %v261_v31  ;;  %v282_v7 = vmul.f32 0.3275911, %v1477_v63  ;;  %v1488_v9 = vsel %vm269_vm4, 1.0, %v1349_v3  ;;  %v291_v10 = vadd.f32 1.0, %v283_v1 }
  0xe8   :  { %v295_v11 = vadd.f32 1.0, %v287_v2  ;;  %v1497_v15 = vsel %vm264_vm5, 1.0, %v1349_v3  ;;  %v384_v16 = vmul.f32 %v376_v61, %v256_v33  ;;  %v388_v17 = vmul.f32 %v380_v62, %v260_v38 }
  0xe9   :  { %1268 = vrcp.f32 %v291_v10  ;;  %v379_v19 = vsub.f32 0.0, %v259_v59  ;;  %v290_v20 = vadd.f32 1.0, %v282_v7  ;;  %v394_v22 = vmul.f32 1.442695, %v385_v5 }
  0xea   :  { %v402_v23 = vmul.f32 1.442695, %v389_v6  ;;  %1270 = vrcp.f32 %v295_v11  ;;  %vm268_vm6 = vcmp.ge.f32.partialorder %v1450_v29, 0.0  ;;  %v383_v26 = vsub.f32 0.0, %v263_v60 }
  0xeb   :  { %v1504_v27 = vmul.f32 0.70710677, %v1490_v12  ;;  %v392_v31 = vmul.f32 1.442695, %v384_v16  ;;  %v400_v32 = vmul.f32 1.442695, %v388_v17  ;;  %v387_v35 = vmul.f32 %v379_v19, %v259_v59 }
  0xec   :  { %1272 = vrcp.f32 %v290_v20  ;;  %v391_v41 = vmul.f32 %v383_v26, %v263_v60  ;;  %v378_v42 = vsub.f32 0.0, %v1477_v63  ;;  %v1533_v17 = vsel %vm268_vm6, 1.0, %v1349_v3 }
  0xed   :  { %v1485_v8 = vpop.eup %1260  ;;  %v1512_v36 = vand.u32 2147483647, %v1504_v27  ;;  %1274 = vpow2.f32 %v394_v22  ;;  %v398_v55 = vmul.f32 1.442695, %v387_v35  ;;  %vm267_vm7 = vcmp.ge.f32.partialorder %v1464_v53, 0.0 }
  0xee   :  { %v1492_v13 = vpop.eup %1262  ;;  %v305_v14 = vmul.f32 1.0614054, %v1485_v8  ;;  %1276 = vpow2.f32 %v402_v23  ;;  %v406_v2 = vmul.f32 1.442695, %v391_v41  ;;  %v386_v5 = vmul.f32 %v378_v42, %v1477_v63 }
  0xef   :  { %v309_v18 = vmul.f32 1.0614054, %v1492_v13  ;;  %v1500_v24 = vpop.eup %1264  ;;  %v286_v43 = vmul.f32 0.3275911, %v1512_v36  ;;  %1278 = vpow2.f32 %v392_v31  ;;  %vm271_vm8 = vcmp.ge.f32.partialorder %v1467_v54, 0.0 }
  0xf0   :  { %v1079_v21 = vadd.f32 -1.4531521, %v305_v14  ;;  %v304_v30 = vmul.f32 1.0614054, %v1500_v24  ;;  %v1508_v33 = vpop.eup %1266  ;;  %1280 = vpow2.f32 %v400_v32  ;;  %v396_v26 = vmul.f32 1.442695, %v386_v5 }
  0xf1   :  { %v1083_v25 = vadd.f32 -1.4531521, %v309_v18  ;;  %v308_v39 = vmul.f32 1.0614054, %v1508_v33  ;;  %v294_v56 = vadd.f32 1.0, %v286_v43  ;;  %vm266_vm9 = vcmp.ge.f32.partialorder %v1472_v58, 0.0 }
  0xf2   :  { %v321_v28 = vmul.f32 %v1485_v8, %v1079_v21  ;;  %v1078_v38 = vadd.f32 -1.4531521, %v304_v30  ;;  %v435_v54 = vmul.f32 0.5, %v1453_v48  ;;  %vm270_vm10 = vcmp.ge.f32.partialorder %v1504_v27, 0.0 }
  0xf3   :  { %v325_v34 = vmul.f32 %v1492_v13, %v1083_v25  ;;  %v1082_v46 = vadd.f32 -1.4531521, %v308_v39  ;;  %v1521_v60 = vpop.eup %1268  ;;  %1282 = vrcp.f32 %v294_v56  ;;  %vm1050_vm5 = vcmask 1041409  }
  0xf4   :  { %v329_v37 = vadd.f32 1.4214138, %v321_v28  ;;  %v320_v45 = vmul.f32 %v1500_v24, %v1078_v38  ;;  %v1524_v6 = vpop.eup %1270  ;;  %v307_v14 = vmul.f32 1.0614054, %v1521_v60  ;;  %1284 = vpow2.f32 %v398_v55 }
  0xf5   :  { %v333_v40 = vadd.f32 1.4214138, %v325_v34  ;;  %v324_v62 = vmul.f32 %v1508_v33, %v1082_v46  ;;  %v311_v63 = vmul.f32 1.0614054, %v1524_v6  ;;  %1286 = vpow2.f32 %v406_v2 }
  0xf6   :  { %v337_v44 = vmul.f32 %v1485_v8, %v329_v37  ;;  %v328_v61 = vadd.f32 1.4214138, %v320_v45  ;;  %v1081_v21 = vadd.f32 -1.4531521, %v307_v14  ;;  %v1537_v22 = vpop.eup %1272  ;;  %v382_v38 = vsub.f32 0.0, %v1512_v36 }
  0xf7   :  { %v341_v47 = vmul.f32 %v1492_v13, %v333_v40  ;;  %v332_v11 = vadd.f32 1.4214138, %v324_v62  ;;  %v1085_v25 = vadd.f32 -1.4531521, %v311_v63  ;;  %v1275_v28 = vpop.eup %1274  ;;  %v306_v37 = vmul.f32 1.0614054, %v1537_v22 }
  0xf8   :  { %v1087_v59 = vadd.f32 -0.28449672, %v337_v44  ;;  %v336_v10 = vmul.f32 %v1500_v24, %v328_v61  ;;  %v323_v32 = vmul.f32 %v1521_v60, %v1081_v21  ;;  %v1277_v39 = vpop.eup %1276  ;;  %1288 = vpow2.f32 %v396_v26 }
  0xf9   :  { %v1091_v1 = vadd.f32 -0.28449672, %v341_v47  ;;  %v340_v20 = vmul.f32 %v1508_v33, %v332_v11  ;;  %v327_v35 = vmul.f32 %v1524_v6, %v1085_v25  ;;  %v1080_v46 = vadd.f32 -1.4531521, %v306_v37 }
  0xfa   :  { %v353_v7 = vmul.f32 %v1485_v8, %v1087_v59  ;;  %v1086_v19 = vadd.f32 -0.28449672, %v336_v10  ;;  %v331_v43 = vadd.f32 1.4214138, %v323_v32  ;;  %v390_v5 = vmul.f32 %v382_v38, %v1512_v36 }
  0xfb   :  { %v357_v16 = vmul.f32 %v1492_v13, %v1091_v1  ;;  %v1090_v31 = vadd.f32 -0.28449672, %v340_v20  ;;  %v335_v45 = vadd.f32 1.4214138, %v327_v35  ;;  %v322_v2 = vmul.f32 %v1537_v22, %v1080_v46 }
  0xfc   :  { %v361_v18 = vadd.f32 0.2548296, %v353_v7  ;;  %v352_v29 = vmul.f32 %v1500_v24, %v1086_v19  ;;  %v339_v59 = vmul.f32 %v1521_v60, %v331_v43 }
  0xfd   :  { %v365_v23 = vadd.f32 0.2548296, %v357_v16  ;;  %v356_v42 = vmul.f32 %v1508_v33, %v1090_v31  ;;  %v343_v1 = vmul.f32 %v1524_v6, %v335_v45 }
  0xfe   :  { %v369_v30 = vmul.f32 %v1485_v8, %v361_v18  ;;  %v360_v41 = vadd.f32 0.2548296, %v352_v29  ;;  %v1279_v8 = vpop.eup %1278  ;;  %v1089_v14 = vadd.f32 -0.28449672, %v339_v59  ;;  %v330_v18 = vadd.f32 1.4214138, %v322_v2 }
  0xff   :  { %v373_v34 = vmul.f32 %v1492_v13, %v365_v23  ;;  %v1281_v47 = vpop.eup %1280  ;;  %v364_v56 = vadd.f32 0.2548296, %v356_v42  ;;  %v1093_v63 = vadd.f32 -0.28449672, %v343_v1 }
 0x100   :  { %v409_v40 = vmul.f32 %v1275_v28, %v369_v30  ;;  %v368_v13 = vmul.f32 %v1500_v24, %v360_v41  ;;  %v1549_v61 = vpop.eup %1282  ;;  %v355_v25 = vmul.f32 %v1521_v60, %v1089_v14 }
 0x101   :  { %v413_v44 = vmul.f32 %v1277_v39, %v373_v34  ;;  %v372_v11 = vmul.f32 %v1508_v33, %v364_v56  ;;  %v1285_v16 = vpop.eup %1284  ;;  %v310_v19 = vmul.f32 1.0614054, %v1549_v61  ;;  %v359_v36 = vmul.f32 %v1524_v6, %v1093_v63 }
 0x102   :  { %v417_v55 = vsub.f32 1.0, %v409_v40  ;;  %v408_v10 = vmul.f32 %v1279_v8, %v368_v13  ;;  %v1287_v26 = vpop.eup %1286  ;;  %v404_v33 = vmul.f32 1.442695, %v390_v5  ;;  %v363_v31 = vadd.f32 0.2548296, %v355_v25 }
 0x103   :  { %v421_v62 = vsub.f32 1.0, %v413_v44  ;;  %v412_v23 = vmul.f32 %v1281_v47, %v372_v11  ;;  %v1084_v28 = vadd.f32 -1.4531521, %v310_v19  ;;  %v367_v32 = vadd.f32 0.2548296, %v359_v36  ;;  %v1289_v41 = vpop.eup %1288 }
 0x104   :  { %v425_v7 = vmul.f32 %v417_v55, %v1482_v4  ;;  %v416_v21 = vsub.f32 1.0, %v408_v10  ;;  %v338_v4 = vmul.f32 %v1537_v22, %v330_v18  ;;  %v371_v40 = vmul.f32 %v1521_v60, %v363_v31  ;;  %v467_v31 = vpop.permute.xlu0 %466 }
 0x105   :  { %v429_v24 = vmul.f32 %v421_v62, %v1488_v9  ;;  %v420_v9 = vsub.f32 1.0, %v412_v23  ;;  %v326_v35 = vmul.f32 %v1549_v61, %v1084_v28  ;;  %v375_v42 = vmul.f32 %v1524_v6, %v367_v32  ;;  %v458_v28 = vld [vmem:[%s1770_s4 + $0x10] sm:$0xff] }
 0x106   :  { %v441_v20 = vadd.f32 1.0, %v425_v7  ;;  %v424_v29 = vmul.f32 %v416_v21, %v1497_v15  ;;  %v1088_v34 = vadd.f32 -0.28449672, %v338_v4  ;;  %1290 = vpow2.f32 %v404_v33 }
 0x107   :  { %v445_v30 = vadd.f32 1.0, %v429_v24  ;;  %v428_v39 = vmul.f32 %v420_v9, %v1533_v17  ;;  %v334_v43 = vadd.f32 1.4214138, %v326_v35  ;;  %v411_v46 = vmul.f32 %v1285_v16, %v371_v40 }
 0x108   :  { %v449_v37 = vmul.f32 %v441_v20, %v1459_v51  ;;  %v440_v38 = vadd.f32 1.0, %v424_v29  ;;  %v354_v15 = vmul.f32 %v1537_v22, %v1088_v34  ;;  %v415_v47 = vmul.f32 %v1287_v26, %v375_v42  ;;  %v472_v29 = vpop.permute.xlu1 %471 }
 0x109   :  { %v453_v8 = vmul.f32 %v445_v30, %v1461_v52  ;;  %v444_v45 = vadd.f32 1.0, %v428_v39  ;;  %v342_v55 = vmul.f32 %v1549_v61, %v334_v43  ;;  %v419_v60 = vsub.f32 1.0, %v411_v46 }
 0x10a   :  { %v448_v44 = vmul.f32 %v440_v38, %v1469_v57  ;;  %v362_v51 = vadd.f32 0.2548296, %v354_v15  ;;  %v275_v6 = vsel %vm267_vm7, 1.0, %v1349_v3  ;;  %v423_v62 = vsub.f32 1.0, %v415_v47 }
 0x10b   :  { %v452_v17 = vmul.f32 %v444_v45, %v1479_v0  ;;  %v1092_v59 = vadd.f32 -0.28449672, %v342_v55  ;;  %v427_v52 = vmul.f32 %v419_v60, %v275_v6  ;;  %v274_v7 = vsel %vm266_vm9, 1.0, %v1349_v3 }
 0x10c   :  { %v1223_v13 = vpack.c.bf16 %v449_v37, %v448_v44  ;;  %v370_v56 = vmul.f32 %v1537_v22, %v362_v51  ;;  %v279_v22 = vsel %vm271_vm8, 1.0, %v1349_v3  ;;  %v434_v16 = vmul.f32 0.5, %v1457_v50  ;;  %v457_v50 = vld [vmem:[%s1770_s4 + $0x8] sm:$0xff]  ;;  %v482_v42 = vpop.permute.xlu1 %481 }
 0x10d   :  { %v1231_v57 = vpack.c.bf16 %v453_v8, %v452_v17  ;;  %v358_v0 = vmul.f32 %v1549_v61, %v1092_v59  ;;  %v443_v2 = vadd.f32 1.0, %v427_v52  ;;  %v431_v11 = vmul.f32 %v423_v62, %v279_v22 }
 0x10e   :  { %1224 = vmatprep.subr.bf16.mxu0 %v1223_v13  ;;  %v410_v1 = vmul.f32 %v1289_v41, %v370_v56  ;;  %v278_v23 = vsel %vm270_vm10, 1.0, %v1349_v3  ;;  %v439_v25 = vmul.f32 0.5, %v1455_v49  ;;  %v438_v4 = vmul.f32 0.5, %v1490_v12  ;;  %v459_v49 = vld [vmem:[%s1770_s4 + $0x18] sm:$0xff] }
 0x10f   :  { %1226 = vmatpush3.bf16.msra.mxu0 %v1223_v13  ;;  %1232 = vmatprep.subr.bf16.mxu1 %v1231_v57  ;;  %v366_v53 = vadd.f32 0.2548296, %v358_v0  ;;  %v451_v24 = vmul.f32 %v443_v2, %v435_v54  ;;  %v447_v19 = vadd.f32 1.0, %v431_v11  ;;  %v1350_v12 = vmov 0.0|0.0  }
 0x110   :  { %v418_v5 = vsub.f32 1.0, %v410_v1  ;;  %1234 = vmatpush3.bf16.msra.mxu1 %v1231_v57  ;;  %v1291_v10 = vpop.eup %1290  ;;  %v1352_v30 = vmov 0.0   ;;  %v477_v1 = vpop.permute.xlu0 %476  ;;  %v1353_v11 = vmov 1966171168  }
 0x111   :  { %v374_v58 = vmul.f32 %v1549_v61, %v366_v53  ;;  %v455_v36 = vmul.f32 %v447_v19, %v439_v25 }
 0x112   :  { %v426_v14 = vmul.f32 %v418_v5, %v274_v7 }
 0x113   :  { %v414_v18 = vmul.f32 %v1291_v10, %v374_v58  ;;  %v888_v58 = vlaneseq }
 0x114   :  { %v442_v63 = vadd.f32 1.0, %v426_v14  ;;  %v1620_v14 = vunpack.c.l.s4 %v1353_v11 }
 0x115   :  { %v422_v21 = vsub.f32 1.0, %v414_v18 }
 0x116   :  { %v450_v20 = vmul.f32 %v442_v63, %v434_v16 }
 0x117   :  { %v430_v26 = vmul.f32 %v422_v21, %v278_v23 }
 0x118   :  { %v1227_v48 = vpack.c.bf16 %v451_v24, %v450_v20 }
 0x119   :  { %v446_v61 = vadd.f32 1.0, %v430_v26 }
 0x11a   :  { %1228 = vmatprep.subr.bf16.mxu0 %v1227_v48 }
 0x11b   :  { %1230 = vmatpush3.bf16.msra.mxu0 %v1227_v48  ;;  %v454_v27 = vmul.f32 %v446_v61, %v438_v4 }
 0x11c   :  { %1239 = vmatprep.subr.bf16.mxu0 %v1350_v12 }
 0x11d   :  { %v1235_v33 = vpack.c.bf16 %v455_v36, %v454_v27 }
 0x11e   :  { %1182 = vmatmul.mubr.msk.f32.vlgmr.msra.gmra.mrb[4].mxu0 %vm484_vm2, %v457_v50 }
 0x11f   :  { %1184 = vmatprep.mubr.msk.f32.mxu0 %vm484_vm2, %v458_v28  ;;  %1236 = vmatprep.subr.bf16.mxu1 %v1235_v33 }
 0x120   :  { %1238 = vmatpush3.bf16.msra.mxu1 %v1235_v33 }
 0x121   :  { %1245 = vmatprep.subr.bf16.mxu1 %v1350_v12 }
 0x122   :  { %1185 = vmatmul.mubr.msk.f32.gmra.mrb[6].mxu0 %vm484_vm2, %v459_v49 }
 0x123   :  { %1196 = vmatmul.mubr.msk.f32.vlgmr.msra.gmra.mrb[4].mxu1 %vm484_vm2, %v457_v50  ;;  %1209 = vmatprep.mubr.msk.f32.mxu0 %vm1351_vm11, %v1352_v30 }
 0x124   :  { %1198 = vmatprep.mubr.msk.f32.mxu1 %vm484_vm2, %v458_v28 }
 0x127   :  { %1199 = vmatmul.mubr.msk.f32.gmra.mrb[6].mxu1 %vm484_vm2, %v459_v49 }
 0x128   :  { %1220 = vmatprep.mubr.msk.f32.mxu1 %vm1351_vm11, %v1352_v30 }
 0x1f1   :  { %v1183_v9 = vpop.f32.mrb[4].mxu0 }
 0x1f2   :  { %v569_v32 = vadd.f32 %v1183_v9, %v472_v29  ;;  %v563_v34 = vpop.f32.mrb[5].mxu0 }
 0x1f3   :  { %v564_v35 = vadd.f32 %v563_v34, %v467_v31 }
 0x1f4   :  { %v668_v37 = vmul.f32 0.70710677, %v569_v32  ;;  %v1622_v63 = vmul.f32 0.5, %v569_v32 }
 0x1f5   :  { %v667_v38 = vmul.f32 0.70710677, %v564_v35  ;;  %v1186_v39 = vpop.f32.mrb[6].mxu0  ;;  %v1632_v23 = vmul.f32 0.5, %v564_v35 }
 0x1f6   :  { %v676_v40 = vand.u32 2147483647, %v668_v37  ;;  %v573_v41 = vpop.f32.mrb[7].mxu0  ;;  %v1197_v15 = vpop.f32.mrb[4].mxu1  ;;  %v1606_v46 = vadd.f32 %v1186_v39, %v482_v42  ;;  %vm684_vm12 = vcmp.ge.f32.partialorder %v668_v37, 0.0 }
 0x1f7   :  { %v675_v43 = vand.u32 2147483647, %v667_v38  ;;  %v654_v44 = vadd.f32 %v1197_v15, %v472_v29  ;;  %v648_v45 = vpop.f32.mrb[5].mxu1  ;;  %v1617_v53 = vadd.f32 %v573_v41, %v477_v1  ;;  %vm683_vm13 = vcmp.ge.f32.partialorder %v667_v38, 0.0 }
 0x1f8   :  { %v700_v8 = vmul.f32 0.3275911, %v676_v40  ;;  %v1608_v51 = vadd.f32 %v648_v45, %v467_v31  ;;  %v796_v56 = vsub.f32 0.0, %v676_v40  ;;  %v1614_v52 = vmul.f32 0.70710677, %v1606_v46 }
 0x1f9   :  { %v699_v47 = vmul.f32 0.3275911, %v675_v43  ;;  %v672_v17 = vmul.f32 0.70710677, %v654_v44  ;;  %v795_v2 = vsub.f32 0.0, %v675_v43  ;;  %v1630_v20 = vsel %vm684_vm12, 1.0, %v1349_v3 }
 0x1fa   :  { %v708_v55 = vadd.f32 1.0, %v700_v8  ;;  %v1611_v13 = vmul.f32 0.70710677, %v1608_v51  ;;  %v1200_v6 = vpop.f32.mrb[6].mxu1  ;;  %v804_v22 = vmul.f32 %v796_v56, %v676_v40  ;;  %v678_v10 = vand.u32 2147483647, %v1614_v52 }
 0x1fb   :  { %v707_v60 = vadd.f32 1.0, %v699_v47  ;;  %v680_v59 = vand.u32 2147483647, %v672_v17  ;;  %v658_v57 = vpop.f32.mrb[7].mxu1  ;;  %v803_v16 = vmul.f32 %v795_v2, %v675_v43  ;;  %v1624_v18 = vadd.f32 %v1200_v6, %v482_v42 }
 0x1fc   :  { %1292 = vrcp.f32 %v708_v55  ;;  %v679_v62 = vand.u32 2147483647, %v1611_v13  ;;  %v702_v24 = vmul.f32 0.3275911, %v678_v10  ;;  %v1627_v19 = vmul.f32 0.70710677, %v1617_v53 }
 0x1fd   :  { %1294 = vrcp.f32 %v707_v60  ;;  %v704_v0 = vmul.f32 0.3275911, %v680_v59  ;;  %v813_v21 = vmul.f32 1.442695, %v804_v22  ;;  %vm688_vm14 = vcmp.ge.f32.partialorder %v672_v17, 0.0 }
 0x1fe   :  { %v703_v5 = vmul.f32 0.3275911, %v679_v62  ;;  %v710_v25 = vadd.f32 1.0, %v702_v24  ;;  %v1635_v26 = vsel %vm683_vm13, 1.0, %v1349_v3  ;;  %v1638_v48 = vmul.f32 0.70710677, %v1624_v18 }
 0x1ff   :  { %v712_v7 = vadd.f32 1.0, %v704_v0  ;;  %v677_v36 = vand.u32 2147483647, %v1627_v19  ;;  %v1643_v61 = vmul.f32 0.5, %v654_v44  ;;  %v811_v50 = vmul.f32 1.442695, %v803_v16 }
 0x200   :  { %v711_v54 = vadd.f32 1.0, %v703_v5  ;;  %v1645_v27 = vadd.f32 %v658_v57, %v477_v1  ;;  %v800_v49 = vsub.f32 0.0, %v680_v59  ;;  %v799_v30 = vsub.f32 0.0, %v679_v62 }
 0x201   :  { %1296 = vrcp.f32 %v712_v7  ;;  %v682_v29 = vand.u32 2147483647, %v1638_v48  ;;  %v1652_v9 = vsel %vm688_vm14, 1.0, %v1349_v3  ;;  %v701_v32 = vmul.f32 0.3275911, %v677_v36 }
 0x202   :  { %1298 = vrcp.f32 %v711_v54  ;;  %vm687_vm15 = vcmp.ge.f32.partialorder %v1611_v13, 0.0  ;;  %v798_v35 = vsub.f32 0.0, %v678_v10  ;;  %v1657_v40 = vmul.f32 0.70710677, %v1645_v27 }
 0x203   :  { %1300 = vrcp.f32 %v710_v25  ;;  %v706_v37 = vmul.f32 0.3275911, %v682_v29  ;;  %v709_v39 = vadd.f32 1.0, %v701_v32  ;;  %v808_v42 = vmul.f32 %v800_v49, %v680_v59 }
 0x204   :  { %1302 = vpow2.f32 %v813_v21  ;;  %v807_v15 = vmul.f32 %v799_v30, %v679_v62  ;;  %v802_v45 = vsub.f32 0.0, %v682_v29  ;;  %v1664_v47 = vand.u32 2147483647, %v1657_v40 }
 0x205   :  { %1304 = vpow2.f32 %v811_v50  ;;  %v714_v43 = vadd.f32 1.0, %v706_v37  ;;  %v806_v6 = vmul.f32 %v798_v35, %v678_v10  ;;  %v1672_v59 = vsel %vm687_vm15, 1.0, %v1349_v3 }
 0x206   :  { %v1641_v4 = vpop.eup %1292  ;;  %1306 = vrcp.f32 %v709_v39  ;;  %v797_v62 = vsub.f32 0.0, %v677_v36  ;;  %v821_v2 = vmul.f32 1.442695, %v808_v42  ;;  %v819_v5 = vmul.f32 1.442695, %v807_v15 }
 0x207   :  { %v1647_v28 = vpop.eup %1294  ;;  %v724_v33 = vmul.f32 1.0614054, %v1641_v4  ;;  %1308 = vrcp.f32 %v714_v43  ;;  %v810_v54 = vmul.f32 %v802_v45, %v682_v29  ;;  %v705_v11 = vmul.f32 0.3275911, %v1664_v47 }
 0x208   :  { %v723_v31 = vmul.f32 1.0614054, %v1647_v28  ;;  %v817_v21 = vmul.f32 1.442695, %v806_v6  ;;  %v805_v49 = vmul.f32 %v797_v62, %v677_v36  ;;  %1310 = vpow2.f32 %v821_v2 }
 0x209   :  { %v1103_v34 = vadd.f32 -1.4531521, %v724_v33  ;;  %v713_v30 = vadd.f32 1.0, %v705_v11  ;;  %v801_v11 = vsub.f32 0.0, %v1664_v47  ;;  %vm686_vm0 = vcmp.ge.f32.partialorder %v1614_v52, 0.0 }
 0x20a   :  { %v1102_v38 = vadd.f32 -1.4531521, %v723_v31  ;;  %vm685_vm1 = vcmp.ge.f32.partialorder %v1627_v19, 0.0  ;;  %vm690_vm3 = vcmp.ge.f32.partialorder %v1638_v48, 0.0  ;;  %v854_v19 = vmul.f32 0.5, %v1606_v46 }
 0x20b   :  { %v740_v41 = vmul.f32 %v1641_v4, %v1103_v34  ;;  %v1660_v8 = vpop.eup %1296  ;;  %1312 = vrcp.f32 %v713_v30  ;;  %vm689_vm4 = vcmp.ge.f32.partialorder %v1657_v40, 0.0 }
 0x20c   :  { %v739_v44 = vmul.f32 %v1647_v28, %v1102_v38  ;;  %v1666_v55 = vpop.eup %1298  ;;  %v728_v60 = vmul.f32 1.0614054, %v1660_v8  ;;  %v825_v38 = vmul.f32 1.442695, %v810_v54  ;;  %1314 = vpow2.f32 %v819_v5 }
 0x20d   :  { %v748_v17 = vadd.f32 1.4214138, %v740_v41  ;;  %v727_v57 = vmul.f32 1.0614054, %v1666_v55  ;;  %v1676_v22 = vpop.eup %1300  ;;  %1316 = vpow2.f32 %v817_v21 }
 0x20e   :  { %v747_v56 = vadd.f32 1.4214138, %v739_v44  ;;  %v1107_v0 = vadd.f32 -1.4531521, %v728_v60  ;;  %v726_v24 = vmul.f32 1.0614054, %v1676_v22  ;;  %v1303_v25 = vpop.eup %1302  ;;  %1318 = vpow2.f32 %v825_v38 }
 0x20f   :  { %v756_v1 = vmul.f32 %v1641_v4, %v748_v17  ;;  %v1106_v10 = vadd.f32 -1.4531521, %v727_v57  ;;  %v1305_v29 = vpop.eup %1304  ;;  %v815_v44 = vmul.f32 1.442695, %v805_v49  ;;  %v809_v38 = vmul.f32 %v801_v11, %v1664_v47 }
 0x210   :  { %v755_v7 = vmul.f32 %v1647_v28, %v747_v56  ;;  %v744_v13 = vmul.f32 %v1660_v8, %v1107_v0  ;;  %v1105_v34 = vadd.f32 -1.4531521, %v726_v24  ;;  %v1687_v15 = vpop.eup %1306 }
 0x211   :  { %v1111_v16 = vadd.f32 -0.28449672, %v756_v1  ;;  %v743_v33 = vmul.f32 %v1666_v55, %v1106_v10  ;;  %v1690_v45 = vpop.eup %1308  ;;  %v725_v56 = vmul.f32 1.0614054, %v1687_v15  ;;  %1320 = vpow2.f32 %v815_v44 }
 0x212   :  { %v1110_v50 = vadd.f32 -0.28449672, %v755_v7  ;;  %v752_v32 = vadd.f32 1.4214138, %v744_v13  ;;  %v742_v42 = vmul.f32 %v1676_v22, %v1105_v34  ;;  %v730_v1 = vmul.f32 1.0614054, %v1690_v45 }
 0x213   :  { %v772_v31 = vmul.f32 %v1641_v4, %v1111_v16  ;;  %v751_v37 = vadd.f32 1.4214138, %v743_v33  ;;  %v1104_v7 = vadd.f32 -1.4531521, %v725_v56  ;;  %v1311_v33 = vpop.eup %1310 }
 0x214   :  { %v771_v35 = vmul.f32 %v1647_v28, %v1110_v50  ;;  %v760_v41 = vmul.f32 %v1660_v8, %v752_v32  ;;  %v750_v6 = vadd.f32 1.4214138, %v742_v42 }
 0x215   :  { %v780_v39 = vadd.f32 0.2548296, %v772_v31  ;;  %v759_v43 = vmul.f32 %v1666_v55, %v751_v37  ;;  %v741_v24 = vmul.f32 %v1687_v15, %v1104_v7  ;;  %v1706_v34 = vpop.eup %1312 }
 0x216   :  { %v779_v36 = vadd.f32 0.2548296, %v771_v35  ;;  %v1115_v60 = vadd.f32 -0.28449672, %v760_v41  ;;  %v758_v5 = vmul.f32 %v1676_v22, %v750_v6 }
 0x217   :  { %v788_v17 = vmul.f32 %v1641_v4, %v780_v39  ;;  %v1114_v62 = vadd.f32 -0.28449672, %v759_v43  ;;  %v1109_v4 = vadd.f32 -1.4531521, %v730_v1  ;;  %v749_v32 = vadd.f32 1.4214138, %v741_v24  ;;  %v1315_v39 = vpop.eup %1314 }
 0x218   :  { %v787_v57 = vmul.f32 %v1647_v28, %v779_v36  ;;  %v776_v2 = vmul.f32 %v1660_v8, %v1115_v60  ;;  %v1113_v28 = vadd.f32 -0.28449672, %v758_v5  ;;  %v1317_v43 = vpop.eup %1316  ;;  %v729_v60 = vmul.f32 1.0614054, %v1706_v34 }
 0x219   :  { %v828_v0 = vmul.f32 %v1303_v25, %v788_v17  ;;  %v775_v54 = vmul.f32 %v1666_v55, %v1114_v62  ;;  %v746_v50 = vmul.f32 %v1690_v45, %v1109_v4  ;;  %v1319_v47 = vpop.eup %1318 }
 0x21a   :  { %v827_v10 = vmul.f32 %v1305_v29, %v787_v57  ;;  %v784_v13 = vadd.f32 0.2548296, %v776_v2  ;;  %v774_v31 = vmul.f32 %v1676_v22, %v1113_v28 }
 0x21b   :  { %v836_v16 = vsub.f32 1.0, %v828_v0  ;;  %v783_v25 = vadd.f32 0.2548296, %v775_v54  ;;  %v754_v37 = vadd.f32 1.4214138, %v746_v50  ;;  %v1321_v28 = vpop.eup %1320 }
 0x21c   :  { %v835_v21 = vsub.f32 1.0, %v827_v10  ;;  %v792_v30 = vmul.f32 %v1660_v8, %v784_v13  ;;  %v782_v36 = vadd.f32 0.2548296, %v774_v31  ;;  %v1108_v0 = vadd.f32 -1.4531521, %v729_v60 }
 0x21d   :  { %v844_v49 = vmul.f32 %v836_v16, %v1630_v20  ;;  %v791_v35 = vmul.f32 %v1666_v55, %v783_v25  ;;  %v757_v20 = vmul.f32 %v1687_v15, %v749_v32  ;;  %v762_v17 = vmul.f32 %v1690_v45, %v754_v37 }
 0x21e   :  { %v843_v29 = vmul.f32 %v835_v21, %v1635_v26  ;;  %v832_v42 = vmul.f32 %v1311_v33, %v792_v30  ;;  %v790_v55 = vmul.f32 %v1676_v22, %v782_v36  ;;  %v823_v10 = vmul.f32 1.442695, %v809_v38 }
 0x21f   :  { %v860_v41 = vadd.f32 1.0, %v844_v49  ;;  %v831_v44 = vmul.f32 %v1315_v39, %v791_v35  ;;  %v1112_v56 = vadd.f32 -0.28449672, %v757_v20  ;;  %v1117_v1 = vadd.f32 -0.28449672, %v762_v17 }
 0x220   :  { %v859_v8 = vadd.f32 1.0, %v843_v29  ;;  %v840_v6 = vsub.f32 1.0, %v832_v42  ;;  %v830_v5 = vmul.f32 %v1317_v43, %v790_v55  ;;  %v745_v22 = vmul.f32 %v1706_v34, %v1108_v0 }
 0x221   :  { %v868_v26 = vmul.f32 %v860_v41, %v1622_v63  ;;  %v839_v62 = vsub.f32 1.0, %v831_v44  ;;  %v773_v7 = vmul.f32 %v1687_v15, %v1112_v56  ;;  %v778_v63 = vmul.f32 %v1690_v45, %v1117_v1 }
 0x222   :  { %v867_v57 = vmul.f32 %v859_v8, %v1632_v23  ;;  %v848_v2 = vmul.f32 %v840_v6, %v1652_v9  ;;  %v855_v16 = vmul.f32 0.5, %v1608_v51  ;;  %v838_v23 = vsub.f32 1.0, %v830_v5 }
 0x223   :  { %v847_v4 = vmul.f32 %v839_v62, %v1672_v59  ;;  %v781_v13 = vadd.f32 0.2548296, %v773_v7  ;;  %v694_v9 = vsel %vm686_vm0, 1.0, %v1349_v3  ;;  %v786_v21 = vadd.f32 0.2548296, %v778_v63 }
 0x224   :  { %v1240_v54 = vpack.c.bf16 %v868_v26, %v867_v57  ;;  %v864_v11 = vadd.f32 1.0, %v848_v2  ;;  %v753_v25 = vadd.f32 1.4214138, %v745_v22  ;;  %v846_v50 = vmul.f32 %v838_v23, %v694_v9 }
 0x225   :  { %v863_v24 = vadd.f32 1.0, %v847_v4  ;;  %v789_v33 = vmul.f32 %v1687_v15, %v781_v13  ;;  %1322 = vpow2.f32 %v823_v10  ;;  %v794_v49 = vmul.f32 %v1690_v45, %v786_v21 }
 0x226   :  { %1241 = vmatpush3.bf16.msra.mxu0 %v1240_v54  ;;  %v872_v59 = vmul.f32 %v864_v11, %v1643_v61  ;;  %v761_v30 = vmul.f32 %v1706_v34, %v753_v25  ;;  %v862_v35 = vadd.f32 1.0, %v846_v50  ;;  %v887_v61 = vunpack.c.0.s8 %v1620_v14 }
 0x227   :  { %1242 = vmatprep.subr.bf16.mxu0 %v1350_v12  ;;  %v871_v51 = vmul.f32 %v863_v24, %v855_v16  ;;  %v829_v52 = vmul.f32 %v1321_v28, %v789_v33  ;;  %v834_v32 = vmul.f32 %v1319_v47, %v794_v49  ;;  %v889_v15 = vshrl.u32 %v888_v58, 7 }
 0x228   :  { %v1116_v29 = vadd.f32 -0.28449672, %v761_v30  ;;  %v693_v39 = vsel %vm685_vm1, 1.0, %v1349_v3  ;;  %v870_v36 = vmul.f32 %v862_v35, %v854_v19  ;;  %v698_v20 = vsel %vm690_vm3, 1.0, %v1349_v3 }
 0x229   :  { %v1246_v31 = vpack.c.bf16 %v872_v59, %v871_v51  ;;  %v837_v37 = vsub.f32 1.0, %v829_v52  ;;  %v842_v38 = vsub.f32 1.0, %v834_v32  ;;  %v853_v14 = vmul.f32 0.5, %v1617_v53 }
 0x22a   :  { %v777_v45 = vmul.f32 %v1706_v34, %v1116_v29  ;;  %v890_v8 = vsub.s32 %v887_v61, %v889_v15  ;;  %v697_v53 = vsel %vm689_vm4, 1.0, %v1349_v3  ;;  %v858_v56 = vmul.f32 0.5, %v1624_v18 }
 0x22b   :  { %1247 = vmatpush3.bf16.msra.mxu1 %v1246_v31  ;;  %v845_v41 = vmul.f32 %v837_v37, %v693_v39  ;;  %v850_v43 = vmul.f32 %v842_v38, %v698_v20  ;;  %v857_v57 = vmul.f32 0.5, %v1645_v27  ;;  %v1044_v3 = vstv %s1772_s6 }
 0x22c   :  { %1248 = vmatprep.subr.bf16.mxu1 %v1350_v12  ;;  %v785_v42 = vadd.f32 0.2548296, %v777_v45  ;;  %v1118_v12 = vld.sshfl [vmem:[%s1767_s1] sm:$0x11 pattern:$0x75316420] }
 0x22d   :  { %v861_v58 = vadd.f32 1.0, %v845_v41  ;;  %v866_v26 = vadd.f32 1.0, %v850_v43  ;;  %v891_v55 = vrot.slane %v1118_v12, %v890_v8  ;;  %v884_v40 = vcombine.high %v1118_v12, %v1118_v12 }
 0x22e   :  { %v793_v48 = vmul.f32 %v1706_v34, %v785_v42 }
 0x22f   :  { %v1323_v44 = vpop.eup %1322  ;;  %v869_v17 = vmul.f32 %v861_v58, %v853_v14  ;;  %v874_v47 = vmul.f32 %v866_v26, %v858_v56  ;;  %v898_v2 = vrot.slane %v884_v40, %v890_v8 }
 0x230   :  { %v833_v60 = vmul.f32 %v1323_v44, %v793_v48 }
 0x231   :  { %v1243_v46 = vpack.c.bf16 %v870_v36, %v869_v17 }
 0x232   :  { %v841_v6 = vsub.f32 1.0, %v833_v60 }
 0x233   :  { %1244 = vmatpush3.bf16.msra.mxu0 %v1243_v46 }
 0x234   :  { %v849_v34 = vmul.f32 %v841_v6, %v697_v53 }
 0x236   :  { %v865_v62 = vadd.f32 1.0, %v849_v34  ;;  %1210 = vmatmul.mubr.msk.f32.vlgmr.msra.gmra.mrb[8].mxu0 %vm484_vm2, %v891_v55 }
 0x238   :  { %v873_v1 = vmul.f32 %v865_v62, %v857_v57 }
 0x23a   :  { %v1249_v0 = vpack.c.bf16 %v874_v47, %v873_v1 }
 0x23c   :  { %1250 = vmatpush3.bf16.msra.mxu1 %v1249_v0 }
 0x23f   :  { %1221 = vmatmul.mubr.msk.f32.vlgmr.msra.gmra.mrb[8].mxu1 %vm484_vm2, %v898_v2 }
 0x309   :  { %v967_v5 = vpop.f32.mrb[8].mxu0 }
 0x30a   :  { %v1211_v7 = vpop.f32.mrb[9].mxu0  ;;  %v1045_v27 = vadd.f32 %v1044_v3, %v967_v5 }
 0x312   :  { %v1039_v18 = vpop.f32.mrb[8].mxu1 }
 0x313   :  { %v1046_v10 = vadd.f32 %v1044_v3, %v1039_v18  ;;  %v1222_v54 = vpop.f32.mrb[9].mxu1 }
 0x315   :  { %v1049_v4 = vrot.slane %v1046_v10, 7 }
 0x317   :  { %v1051_v63 = vsel %vm1050_vm5, %v1049_v4, %v1045_v27 }
 0x318   :  { %1053 = vst [vmem:[#allocation3] sm:$0x3] %v1051_v63 }
 0x319   :  { %1335 = shalt.err (!%p1332_p4)
}
 0x31a   :  { %s1336_s15 = scalar_lea.hbm %s1773_s7, 32 }
 0x31b   :  { %p1337_p5 = scmp.ne.s32.totalorder %s1773_s7, %s1336_s15  ;;  %p1340_p6 = scmp.lt.u32.totalorder %s1336_s15, %s1773_s7 }
 0x31d   :  { %p1342_p7 = pnand %p1340_p6, %p1337_p5 }
 0x31f   :  { %1345 = shalt.err (!%p1342_p7)
}
 0x320   :  { %1063 = dma.vmem_to_hbm [thread:$0]  %s1061_s12, 32, %s1773_s7, [#allocation4]  }
 0x321   :  { %1346 = dma.done.wait [#allocation4], 32  }
 0x322   :  { %1347 = vsyncadd [#allocation4], 4294967264 }
 0x323   :  { %1067 = vsyncpa [#allocation4], 1 }

</bundles_post_ra>
